<compile_context>
chip_gen: v7x
topology: tpu7x:2x2x1
jax: 0.10.0
libtpu: 0.0.40
codegen_flags: <defaults>
</compile_context>

<pallas_src>
import jax
import jax.numpy as jnp
from jax.experimental import pallas as pl
from jax.experimental.pallas import tpu as pltpu


# -----------------------------------------------------------------------------
# Weight preparation (host-side layout / precision / fusion glue).
# -----------------------------------------------------------------------------
def _weight_norm_eff(v, g):
    # PyTorch weight_norm (dim=0): per-output-row L2 norm over the input dim.
    norm = jnp.sqrt(jnp.sum(v * v, axis=1, keepdims=True))
    return g * v / norm


def prepare_params(params):
    """Pre-transpose to (in,out), apply weight_norm, fuse, cast matmul weights to bf16."""
    bf = lambda w: w.astype(jnp.bfloat16)
    # Fused visual projection: one (C, Hd+E) matmul replaces image2hidden + image2embed.
    wi2T = jnp.concatenate([params["wi2h"].T, params["wi2e"].T], axis=1)     # (C, Hd+E)
    bi2 = jnp.concatenate([params["bi2h"], params["bi2e"]], axis=1)          # (1, Hd+E)
    # Fused LSTMCell: gates = [x ; h] @ [Wih ; Whh]^T + (bih + bhh).
    wxhT = jnp.concatenate([params["wih"].T, params["whh"].T], axis=0)       # (E+Hd, 4Hd)
    bxh = params["bih"] + params["bhh"]                                      # (1, 4Hd)
    return {
        # kernel-side (MXU) weights
        "wvT": bf(params["wv"].T),   "bv": params["bv"],                     # visual2att
        "whT": bf(params["wh"].T),   "bh": params["bh"],                     # hidden2att
        "wa": params["wa"],          "ba": params["ba"],                     # att2weight
        "wi2T": bf(wi2T),            "bi2": bi2,                             # fused visual proj
        "wxhT": bf(wxhT),            "bxh": bxh,                             # fused LSTM
        "wh0T": bf(_weight_norm_eff(params["init_h_v"], params["init_h_g"]).T),
        "bh0": params["init_h_b"],
        "wc0T": bf(_weight_norm_eff(params["init_c_v"], params["init_c_g"]).T),
        "bc0": params["init_c_b"],
        "wfcT": bf(_weight_norm_eff(params["fc_v"], params["fc_g"]).T),
        "bfc": params["fc_b"],
        "embed": bf(params["embed"]),
        # un-fused copies kept only for the pure-JAX reference
        "wi2hT": bf(params["wi2h"].T), "bi2h": params["bi2h"],
        "wi2eT": bf(params["wi2e"].T), "bi2e": params["bi2e"],
        "wihT": bf(params["wih"].T),   "bih": params["bih"],
        "whhT": bf(params["whh"].T),   "bhh": params["bhh"],
    }


def _num_blocks(B, requested):
    """Only split the batch when every block keeps a sublane-aligned (mult of 8) row count."""
    if requested > 1 and B % (8 * requested) == 0:
        return requested
    return 1


# -----------------------------------------------------------------------------
# Precompute kernel (runs once): global mean, h0/c0 init, visual-attention projection.
# -----------------------------------------------------------------------------
def _precompute_kernel(spat_ref, wvT_ref, bv_ref, wh0T_ref, bh0_ref, wc0T_ref, bc0_ref,
                       vatt_ref, h0_ref, c0_ref):
    sf = spat_ref[...]                                    # (tb, P, C) bf16
    tb, P, C = sf.shape
    # Global features: per-example pixel sum on the MXU (bf16 x bf16 -> f32 accumulate);
    # avoids materializing an f32 copy of the whole feature map. One f32 scale by 1/P after.
    ones_p = jnp.ones((tb, 1, P), dtype=jnp.bfloat16)
    gsum = jnp.einsum('bqp,bpc->bqc', ones_p, sf,
                      preferred_element_type=jnp.float32)[:, 0, :]          # (tb, C) f32
    glob_b = (gsum * (1.0 / P)).astype(jnp.bfloat16)
    h0_ref[...] = jnp.dot(glob_b, wh0T_ref[...],
                          preferred_element_type=jnp.float32) + bh0_ref[...]
    c0_ref[...] = jnp.dot(glob_b, wc0T_ref[...],
                          preferred_element_type=jnp.float32) + bc0_ref[...]
    # Loop-invariant visual attention projection, stored in bf16 (halves HBM / VMEM).
    vatt = jnp.dot(sf.reshape(tb * P, C), wvT_ref[...],
                   preferred_element_type=jnp.float32) + bv_ref[...]
    vatt_ref[...] = vatt.reshape(tb, P, -1).astype(vatt_ref.dtype)


def sat_precompute(spatial_bf16, prep, *, num_batch_blocks=1):
    B, P, C = spatial_bf16.shape
    A = prep["wvT"].shape[1]
    Hd = prep["wh0T"].shape[1]
    nb = _num_blocks(B, num_batch_blocks)
    tb = B // nb

    def wspec(*dims):
        nd = len(dims)
        return pl.BlockSpec(dims, lambda b, _n=nd: (0,) * _n)

    grid_spec = pltpu.PrefetchScalarGridSpec(
        num_scalar_prefetch=0,
        grid=(nb,),
        in_specs=[pl.BlockSpec((tb, P, C), lambda b: (b, 0, 0)),
                  wspec(C, A), wspec(1, A),
                  wspec(C, Hd), wspec(1, Hd),
                  wspec(C, Hd), wspec(1, Hd)],
        out_specs=(pl.BlockSpec((tb, P, A), lambda b: (b, 0, 0)),
                   pl.BlockSpec((tb, Hd), lambda b: (b, 0)),
                   pl.BlockSpec((tb, Hd), lambda b: (b, 0))),
    )
    return pl.pallas_call(
        _precompute_kernel,
        out_shape=(jax.ShapeDtypeStruct((B, P, A), jnp.bfloat16),
                   jax.ShapeDtypeStruct((B, Hd), jnp.float32),
                   jax.ShapeDtypeStruct((B, Hd), jnp.float32)),
        grid_spec=grid_spec,
        compiler_params=pltpu.CompilerParams(
            dimension_semantics=("parallel",),
            vmem_limit_bytes=48 * 1024 * 1024),
    )(spatial_bf16, prep["wvT"], prep["bv"],
      prep["wh0T"], prep["bh0"], prep["wc0T"], prep["bc0"])


# -----------------------------------------------------------------------------
# Decoder kernel: grid = (batch_blocks,); all T timesteps run in an in-kernel fori_loop.
# Emits pre-FC activations (h_new + visual_hidden) into a resident (T, tb, Hd) block.
# -----------------------------------------------------------------------------
def _decoder_kernel(
    spat_ref, vatt_ref, emb_ref, h0_ref, c0_ref,
    whT_ref, bh_ref, wa_ref, ba_ref,                  # hidden2att / att2weight
    wi2T_ref, bi2_ref,                                # fused image2{hidden,embed}: (C, Hd+E)
    wxhT_ref, bxh_ref,                                # fused LSTMCell: (E+Hd, 4Hd)
    out_ref,                                          # (T, tb, Hd) pre-FC output (bf16)
    xh_sc,                                            # VMEM scratch (tb, E+Hd) f32
):
    T = emb_ref.shape[0]
    E = emb_ref.shape[2]
    Hd = h0_ref.shape[-1]

    def step(t, carry):
        h, c = carry                                                       # (tb, Hd) f32
        h_bf = h.astype(jnp.bfloat16)                                      # cast once, reused

        # ---- Spatial_Attention (visual_att hoisted into vatt_ref, bf16) ----
        hidden_att = jnp.dot(h_bf, whT_ref[...],
                             preferred_element_type=jnp.float32) + bh_ref[...]     # (tb, A)
        att = jnp.tanh(vatt_ref[...] + hidden_att[:, None, :])                     # (tb, P, A)
        alpha = jnp.sum(att * wa_ref[...], axis=-1) + ba_ref[...]                  # (tb, P)
        alpha = alpha - jnp.max(alpha, axis=1, keepdims=True)
        e = jnp.exp(alpha)
        att_w = e * pl.reciprocal(jnp.sum(e, axis=1, keepdims=True), approx=True)
        # Weighted pixel sum on the MXU (batched bf16 contraction) — no (tb,P,C) f32 temp.
        sfw = jnp.einsum('bqp,bpc->bqc', att_w.astype(jnp.bfloat16)[:, None, :],
                         spat_ref[...], preferred_element_type=jnp.float32)[:, 0, :]

        # ---- fused visual projections: (C) -> (Hd | E) in one MXU push ----
        vis = jnp.dot(sfw.astype(jnp.bfloat16), wi2T_ref[...],
                      preferred_element_type=jnp.float32) + bi2_ref[...]
        visual_hidden = vis[:, :Hd]                                        # (tb, Hd)
        visual_embed = vis[:, Hd:]                                         # (tb, E)

        # ---- fused LSTMCell: gates = [x ; h] @ [Wih ; Whh] + (bih + bhh) ----
        # Build [x ; h] with static lane-sliced stores into a small f32 scratch.
        xh_sc[:, :E] = emb_ref[t].astype(jnp.float32) + visual_embed
        xh_sc[:, E:] = h
        gates = jnp.dot(xh_sc[...].astype(jnp.bfloat16), wxhT_ref[...],
                        preferred_element_type=jnp.float32) + bxh_ref[...]
        i_g = jax.nn.sigmoid(gates[:, 0 * Hd:1 * Hd])
        f_g = jax.nn.sigmoid(gates[:, 1 * Hd:2 * Hd])
        g_g = jnp.tanh(gates[:, 2 * Hd:3 * Hd])
        o_g = jax.nn.sigmoid(gates[:, 3 * Hd:4 * Hd])
        c_new = f_g * c + i_g * g_g
        h_new = o_g * jnp.tanh(c_new)

        # ---- pre-FC output (dropout == identity in eval mode) ----
        out_ref[t] = (h_new + visual_hidden).astype(out_ref.dtype)         # untiled-axis store
        return (h_new, c_new)

    jax.lax.fori_loop(0, T, step, (h0_ref[...], c0_ref[...]))


def sat_decode(spatial, vatt, emb_tbe, h0, c0, prep, *, num_batch_blocks=1):
    B, P, C = spatial.shape
    T, _, E = emb_tbe.shape
    A = vatt.shape[-1]
    Hd = h0.shape[-1]
    nb = _num_blocks(B, num_batch_blocks)
    tb = B // nb

    def wspec(*dims):
        nd = len(dims)
        return pl.BlockSpec(dims, lambda b, _n=nd: (0,) * _n)

    in_specs = [
        pl.BlockSpec((tb, P, C), lambda b: (b, 0, 0)),   # spatial features (bf16)
        pl.BlockSpec((tb, P, A), lambda b: (b, 0, 0)),   # hoisted visual_att (bf16)
        pl.BlockSpec((T, tb, E), lambda b: (0, b, 0)),   # all-T embeddings (resident)
        pl.BlockSpec((tb, Hd), lambda b: (b, 0)),        # h0
        pl.BlockSpec((tb, Hd), lambda b: (b, 0)),        # c0
        wspec(Hd, A), wspec(1, A),                       # hidden2att
        wspec(1, A), wspec(1, 1),                        # att2weight
        wspec(C, Hd + E), wspec(1, Hd + E),              # fused visual projection
        wspec(E + Hd, 4 * Hd), wspec(1, 4 * Hd),         # fused LSTM
    ]

    grid_spec = pltpu.PrefetchScalarGridSpec(
        num_scalar_prefetch=0,
        grid=(nb,),
        in_specs=in_specs,
        out_specs=pl.BlockSpec((T, tb, Hd), lambda b: (0, b, 0)),
        scratch_shapes=[pltpu.VMEM((tb, E + Hd), jnp.float32)],
    )

    return pl.pallas_call(
        _decoder_kernel,
        out_shape=jax.ShapeDtypeStruct((T, B, Hd), jnp.bfloat16),
        grid_spec=grid_spec,
        compiler_params=pltpu.CompilerParams(
            dimension_semantics=("parallel",),
            # Safe on all generations (< v7x's 64 MiB/TC). On v5e/v6e at real shapes this can
            # be raised toward ~96 MiB to keep the full batch resident in one block.
            vmem_limit_bytes=48 * 1024 * 1024),
    )(spatial, vatt, emb_tbe, h0, c0,
      prep["whT"], prep["bh"], prep["wa"], prep["ba"],
      prep["wi2T"], prep["bi2"],
      prep["wxhT"], prep["bxh"])


# -----------------------------------------------------------------------------
# Hoisted vocab projection: lane-dense 2-D tiled matmul over (B*T, Hd) x (Hd, V).
# -----------------------------------------------------------------------------
def _fc_kernel(x_ref, w_ref, b_ref, o_ref):
    o_ref[...] = (jnp.dot(x_ref[...], w_ref[...], preferred_element_type=jnp.float32)
                  + b_ref[...]).astype(o_ref.dtype)


def sat_fc(x2d, wfcT, bfc):
    M, Hd = x2d.shape
    V = wfcT.shape[1]

    def pick_tile(n, cands):
        for c in cands:
            if n % c == 0:
                return c
        return n

    tm = pick_tile(M, (256, 128)) if (M % 8 == 0 and M >= 128) else M
    tn = pick_tile(V, (512, 256, 128))
    return pl.pallas_call(
        _fc_kernel,
        out_shape=jax.ShapeDtypeStruct((M, V), jnp.float32),
        grid_spec=pltpu.PrefetchScalarGridSpec(
            num_scalar_prefetch=0,
            grid=(M // tm, V // tn),
            in_specs=[pl.BlockSpec((tm, Hd), lambda i, j: (i, 0)),
                      pl.BlockSpec((Hd, tn), lambda i, j: (0, j)),
                      pl.BlockSpec((1, tn), lambda i, j: (0, j))],
            out_specs=pl.BlockSpec((tm, tn), lambda i, j: (i, j))),
        compiler_params=pltpu.CompilerParams(
            dimension_semantics=("parallel", "parallel"),
            vmem_limit_bytes=48 * 1024 * 1024),
    )(x2d, wfcT, bfc)


# -----------------------------------------------------------------------------
# End-to-end forward (Pallas).
# -----------------------------------------------------------------------------
def sat_forward_pallas(feats_nchw, cap, cap_len, prep, *, num_batch_blocks=1):
    T = int(max(cap_len))
    B, C, H, W = feats_nchw.shape
    V = prep["wfcT"].shape[1]
    Hd = prep["wh0T"].shape[1]
    # Layout glue: NCHW -> (B, P, C), cast to bf16 (MXU fast path).
    spatial = jnp.transpose(feats_nchw, (0, 2, 3, 1)).reshape(B, H * W, C).astype(jnp.bfloat16)
    emb_tbe = jnp.transpose(prep["embed"][cap[:, :T]], (1, 0, 2))          # (T, B, E) bf16

    vatt, h0, c0 = sat_precompute(spatial, prep, num_batch_blocks=num_batch_blocks)
    pre_fc = sat_decode(spatial, vatt, emb_tbe, h0, c0, prep,
                        num_batch_blocks=num_batch_blocks)                  # (T, B, Hd) bf16
    # Only the small Hd-wide pre-FC tensor is reordered; the big (V-wide) logits are then
    # produced directly in (B, T, V) order — no HBM transpose of the largest tensor.
    pre_bt = jnp.transpose(pre_fc, (1, 0, 2)).reshape(B * T, Hd)
    logits = sat_fc(pre_bt, prep["wfcT"], prep["bfc"])                      # (B*T, V) f32
    return logits.reshape(B, T, V)


# -----------------------------------------------------------------------------
# Pure-JAX reference: mirrors the PyTorch forward math with the same precision
# policy as the kernels (bf16 matmul operands / bf16 vatt, f32 accumulation).
# -----------------------------------------------------------------------------
def sat_forward_ref(feats_nchw, cap, cap_len, prep):
    T = int(max(cap_len))
    B, C, H, W = feats_nchw.shape
    bf = jnp.bfloat16
    spatial = jnp.transpose(feats_nchw, (0, 2, 3, 1)).reshape(B, H * W, C).astype(bf)
    glob = jnp.mean(spatial.astype(jnp.float32), axis=1)
    P = H * W

    def mm(x, wT, b):
        return jnp.dot(x.astype(bf), wT, preferred_element_type=jnp.float32) + b

    h = mm(glob, prep["wh0T"], prep["bh0"])
    c = mm(glob, prep["wc0T"], prep["bc0"])
    vatt = (jnp.dot(spatial.reshape(B * P, C), prep["wvT"],
                    preferred_element_type=jnp.float32) + prep["bv"]).reshape(B, P, -1)
    vatt = vatt.astype(bf)   # stored in bf16, matching the kernel pipeline
    emb = prep["embed"][cap[:, :T]]

    outs = []
    for t in range(T):
        hidden_att = mm(h, prep["whT"], prep["bh"])
        att = jnp.tanh(vatt + hidden_att[:, None, :])
        alpha = jnp.sum(att * prep["wa"], axis=-1) + prep["ba"]
        w = jax.nn.softmax(alpha, axis=1)
        sfw = jnp.einsum('bp,bpc->bc', w.astype(bf), spatial,
                         preferred_element_type=jnp.float32)
        vh = mm(sfw, prep["wi2hT"], prep["bi2h"])
        ve = mm(sfw, prep["wi2eT"], prep["bi2e"])
        x = emb[:, t, :].astype(jnp.float32) + ve
        gates = mm(x, prep["wihT"], prep["bih"]) + mm(h, prep["whhT"], prep["bhh"])
        i_g, f_g, g_g, o_g = jnp.split(gates, 4, axis=1)
        c = jax.nn.sigmoid(f_g) * c + jax.nn.sigmoid(i_g) * jnp.tanh(g_g)
        h = jax.nn.sigmoid(o_g) * jnp.tanh(c)
        pre = (h + vh).astype(bf)
        outs.append(jnp.dot(pre, prep["wfcT"], preferred_element_type=jnp.float32) + prep["bfc"])
    return jnp.stack(outs, axis=1)


# -----------------------------------------------------------------------------
# Deterministic parameter init (shapes follow the PyTorch __init__).
# -----------------------------------------------------------------------------
def init_params(key, C, Hd, A, E, V):
    ks = jax.random.split(key, 24)
    u = lambda k, s, sc=0.1: jax.random.uniform(k, s, jnp.float32, -sc, sc)
    return {
        "wv": u(ks[0], (A, C)),      "bv": u(ks[1], (1, A)),
        "wh": u(ks[2], (A, Hd)),     "bh": u(ks[3], (1, A)),
        "wa": u(ks[4], (1, A)),      "ba": u(ks[5], (1, 1)),
        "wi2h": u(ks[6], (Hd, C)),   "bi2h": u(ks[7], (1, Hd)),
        "wi2e": u(ks[8], (E, C)),    "bi2e": u(ks[9], (1, E)),
        "wih": u(ks[10], (4 * Hd, E)),  "bih": u(ks[11], (1, 4 * Hd)),
        "whh": u(ks[12], (4 * Hd, Hd)), "bhh": u(ks[13], (1, 4 * Hd)),
        "embed": u(ks[14], (V, E)),
        "init_h_v": u(ks[15], (Hd, C)), "init_h_g": 1.0 + u(ks[16], (Hd, 1)),
        "init_h_b": u(ks[17], (1, Hd)),
        "init_c_v": u(ks[18], (Hd, C)), "init_c_g": 1.0 + u(ks[19], (Hd, 1)),
        "init_c_b": u(ks[20], (1, Hd)),
        "fc_v": u(ks[21], (V, Hd)),  "fc_g": 1.0 + u(ks[22], (V, 1)),
        "fc_b": jnp.zeros((1, V), jnp.float32),
    }


if __name__ == "__main__":
    # Small config: image_dim=32, hidden_dim=32, att_dim=16, embed_dim=32, vocab=128
    # (vocab chosen as a multiple of 128 so logits are lane-dense).
    B, C, H, W = 2, 32, 4, 4
    Hd, A, E, V = 32, 16, 32, 128
    T = 8

    key = jax.random.PRNGKey(0)
    k_feat, k_cap, k_par = jax.random.split(key, 3)

    feats = jax.random.normal(k_feat, (B, C, H, W), jnp.float32)   # CNN feature map (NCHW)
    cap = jax.random.randint(k_cap, (B, T), 0, V)                  # caption token ids
    cap_len = [T, T - 2]
    params = init_params(k_par, C, Hd, A, E, V)
    prep = prepare_params(params)

    logit = jax.block_until_ready(sat_forward_pallas(feats, cap, cap_len, prep))

    ref = sat_forward_ref(feats, cap, cap_len, prep)
    assert logit.shape == (B, max(cap_len), V)
    err = float(jnp.max(jnp.abs(logit - ref)))
    assert jnp.allclose(logit, ref, rtol=5e-3, atol=5e-3), f"max abs err {err}"

    print("KERNEL_OK")
</pallas_src>

<mosaic_0001>
module attributes {stable_mosaic.version = 11 : i64} {
  func.func @_precompute_kernel(%arg0: i32, %arg1: memref<2x16x32xbf16, #tpu.memory_space<vmem>>, %arg2: memref<32x16xbf16, #tpu.memory_space<vmem>>, %arg3: memref<1x16xf32, #tpu.memory_space<vmem>>, %arg4: memref<32x32xbf16, #tpu.memory_space<vmem>>, %arg5: memref<1x32xf32, #tpu.memory_space<vmem>>, %arg6: memref<32x32xbf16, #tpu.memory_space<vmem>>, %arg7: memref<1x32xf32, #tpu.memory_space<vmem>>, %arg8: memref<2x16x16xbf16, #tpu.memory_space<vmem>>, %arg9: memref<2x32xf32, #tpu.memory_space<vmem>>, %arg10: memref<2x32xf32, #tpu.memory_space<vmem>>) attributes {dimension_semantics = [#tpu.dimension_semantics<parallel>], iteration_bounds = array<i64: 1>, scalar_prefetch = 0 : i64, scratch_operands = 0 : i64, tpu.core_type = #tpu.core_type<tc>, window_params = [{transform_indices = @transform_0, window_bounds = array<i64: 2, 16, 32>}, {pipeline_mode = #tpu.pipeline_mode<synchronous>, transform_indices = @transform_1, window_bounds = array<i64: 32, 16>}, {pipeline_mode = #tpu.pipeline_mode<synchronous>, transform_indices = @transform_2, window_bounds = array<i64: 1, 16>}, {pipeline_mode = #tpu.pipeline_mode<synchronous>, transform_indices = @transform_3, window_bounds = array<i64: 32, 32>}, {pipeline_mode = #tpu.pipeline_mode<synchronous>, transform_indices = @transform_4, window_bounds = array<i64: 1, 32>}, {pipeline_mode = #tpu.pipeline_mode<synchronous>, transform_indices = @transform_5, window_bounds = array<i64: 32, 32>}, {pipeline_mode = #tpu.pipeline_mode<synchronous>, transform_indices = @transform_6, window_bounds = array<i64: 1, 32>}, {transform_indices = @transform_7, window_bounds = array<i64: 2, 16, 16>}, {transform_indices = @transform_8, window_bounds = array<i64: 2, 32>}, {transform_indices = @transform_9, window_bounds = array<i64: 2, 32>}]} {
    %c0 = arith.constant 0 : index
    %c0_0 = arith.constant 0 : index
    %c0_1 = arith.constant 0 : index
    %0 = vector.load %arg1[%c0, %c0_0, %c0_1] : memref<2x16x32xbf16, #tpu.memory_space<vmem>>, vector<2x16x32xbf16>
    %cst = arith.constant 1.000000e+00 : bf16
    %1 = vector.broadcast %cst : bf16 to vector<2x1x16xbf16>
    "tpu.trace_start"() <{level = 10 : i32, message = "bqp,bpc->bqc"}> : () -> ()
    %cst_2 = arith.constant dense<0.000000e+00> : vector<2x1x32xf32>
    %2 = tpu.matmul %1, %0, %cst_2 {dimension_numbers = #tpu.dot_dimension_numbers<[2], [1], [1], [2], [0, 0, 0, 1, 1, 2], [0], [0]>} : vector<2x1x16xbf16>, vector<2x16x32xbf16>, vector<2x1x32xf32> -> vector<2x1x32xf32>
    "tpu.trace_stop"() : () -> ()
    %3 = vector.shape_cast %2 : vector<2x1x32xf32> to vector<2x32xf32>
    %cst_3 = arith.constant 6.250000e-02 : f32
    %4 = vector.broadcast %cst_3 : f32 to vector<2x32xf32>
    %5 = arith.mulf %3, %4 : vector<2x32xf32>
    %6 = arith.truncf %5 : vector<2x32xf32> to vector<2x32xbf16>
    %c0_4 = arith.constant 0 : index
    %c0_5 = arith.constant 0 : index
    %7 = vector.load %arg4[%c0_4, %c0_5] : memref<32x32xbf16, #tpu.memory_space<vmem>>, vector<32x32xbf16>
    %cst_6 = arith.constant dense<0.000000e+00> : vector<2x32xf32>
    %8 = tpu.matmul %6, %7, %cst_6 {dimension_numbers = #tpu.dot_dimension_numbers<[1], [0], [0], [1], [0, 0, 1, 1], [], []>} : vector<2x32xbf16>, vector<32x32xbf16>, vector<2x32xf32> -> vector<2x32xf32>
    %c0_7 = arith.constant 0 : index
    %c0_8 = arith.constant 0 : index
    %9 = vector.load %arg5[%c0_7, %c0_8] : memref<1x32xf32, #tpu.memory_space<vmem>>, vector<1x32xf32>
    %10 = vector.broadcast %9 : vector<1x32xf32> to vector<2x32xf32>
    %11 = arith.addf %8, %10 : vector<2x32xf32>
    %c0_9 = arith.constant 0 : index
    %c0_10 = arith.constant 0 : index
    %12 = vector.load %arg9[%c0_9, %c0_10] : memref<2x32xf32, #tpu.memory_space<vmem>>, vector<2x32xf32>
    tpu.vector_store %arg9[%c0_9, %c0_10], %11 {strides = array<i32>} : memref<2x32xf32, #tpu.memory_space<vmem>>, vector<2x32xf32>,
    %c0_11 = arith.constant 0 : index
    %c0_12 = arith.constant 0 : index
    %13 = vector.load %arg6[%c0_11, %c0_12] : memref<32x32xbf16, #tpu.memory_space<vmem>>, vector<32x32xbf16>
    %cst_13 = arith.constant dense<0.000000e+00> : vector<2x32xf32>
    %14 = tpu.matmul %6, %13, %cst_13 {dimension_numbers = #tpu.dot_dimension_numbers<[1], [0], [0], [1], [0, 0, 1, 1], [], []>} : vector<2x32xbf16>, vector<32x32xbf16>, vector<2x32xf32> -> vector<2x32xf32>
    %c0_14 = arith.constant 0 : index
    %c0_15 = arith.constant 0 : index
    %15 = vector.load %arg7[%c0_14, %c0_15] : memref<1x32xf32, #tpu.memory_space<vmem>>, vector<1x32xf32>
    %16 = vector.broadcast %15 : vector<1x32xf32> to vector<2x32xf32>
    %17 = arith.addf %14, %16 : vector<2x32xf32>
    %c0_16 = arith.constant 0 : index
    %c0_17 = arith.constant 0 : index
    %18 = vector.load %arg10[%c0_16, %c0_17] : memref<2x32xf32, #tpu.memory_space<vmem>>, vector<2x32xf32>
    tpu.vector_store %arg10[%c0_16, %c0_17], %17 {strides = array<i32>} : memref<2x32xf32, #tpu.memory_space<vmem>>, vector<2x32xf32>,
    %19 = vector.shape_cast %0 : vector<2x16x32xbf16> to vector<32x32xbf16>
    %c0_18 = arith.constant 0 : index
    %c0_19 = arith.constant 0 : index
    %20 = vector.load %arg2[%c0_18, %c0_19] : memref<32x16xbf16, #tpu.memory_space<vmem>>, vector<32x16xbf16>
    %cst_20 = arith.constant dense<0.000000e+00> : vector<32x16xf32>
    %21 = tpu.matmul %19, %20, %cst_20 {dimension_numbers = #tpu.dot_dimension_numbers<[1], [0], [0], [1], [0, 0, 1, 1], [], []>} : vector<32x32xbf16>, vector<32x16xbf16>, vector<32x16xf32> -> vector<32x16xf32>
    %c0_21 = arith.constant 0 : index
    %c0_22 = arith.constant 0 : index
    %22 = vector.load %arg3[%c0_21, %c0_22] : memref<1x16xf32, #tpu.memory_space<vmem>>, vector<1x16xf32>
    %23 = vector.broadcast %22 : vector<1x16xf32> to vector<32x16xf32>
    %24 = arith.addf %21, %23 : vector<32x16xf32>
    %25 = vector.shape_cast %24 : vector<32x16xf32> to vector<2x16x16xf32>
    %26 = arith.truncf %25 : vector<2x16x16xf32> to vector<2x16x16xbf16>
    %c0_23 = arith.constant 0 : index
    %c0_24 = arith.constant 0 : index
    %c0_25 = arith.constant 0 : index
    %27 = vector.load %arg8[%c0_23, %c0_24, %c0_25] : memref<2x16x16xbf16, #tpu.memory_space<vmem>>, vector<2x16x16xbf16>
    tpu.vector_store %arg8[%c0_23, %c0_24, %c0_25], %26 {strides = array<i32>} : memref<2x16x16xbf16, #tpu.memory_space<vmem>>, vector<2x16x16xbf16>,
    return
  }
  func.func @transform_0(%arg0: i32) -> (i32, i32, i32) {
    %c0_i32 = arith.constant 0 : i32
    %c0_i32_0 = arith.constant 0 : i32
    %c0_i32_1 = arith.constant 0 : i32
    return %arg0, %c0_i32, %c0_i32_0 : i32, i32, i32
  }
  func.func @transform_1(%arg0: i32) -> (i32, i32) {
    %c0_i32 = arith.constant 0 : i32
    %c0_i32_0 = arith.constant 0 : i32
    %c0_i32_1 = arith.constant 0 : i32
    return %c0_i32, %c0_i32_0 : i32, i32
  }
  func.func @transform_2(%arg0: i32) -> (i32, i32) {
    %c0_i32 = arith.constant 0 : i32
    %c0_i32_0 = arith.constant 0 : i32
    %c0_i32_1 = arith.constant 0 : i32
    return %c0_i32, %c0_i32_0 : i32, i32
  }
  func.func @transform_3(%arg0: i32) -> (i32, i32) {
    %c0_i32 = arith.constant 0 : i32
    %c0_i32_0 = arith.constant 0 : i32
    %c0_i32_1 = arith.constant 0 : i32
    return %c0_i32, %c0_i32_0 : i32, i32
  }
  func.func @transform_4(%arg0: i32) -> (i32, i32) {
    %c0_i32 = arith.constant 0 : i32
    %c0_i32_0 = arith.constant 0 : i32
    %c0_i32_1 = arith.constant 0 : i32
    return %c0_i32, %c0_i32_0 : i32, i32
  }
  func.func @transform_5(%arg0: i32) -> (i32, i32) {
    %c0_i32 = arith.constant 0 : i32
    %c0_i32_0 = arith.constant 0 : i32
    %c0_i32_1 = arith.constant 0 : i32
    return %c0_i32, %c0_i32_0 : i32, i32
  }
  func.func @transform_6(%arg0: i32) -> (i32, i32) {
    %c0_i32 = arith.constant 0 : i32
    %c0_i32_0 = arith.constant 0 : i32
    %c0_i32_1 = arith.constant 0 : i32
    return %c0_i32, %c0_i32_0 : i32, i32
  }
  func.func @transform_7(%arg0: i32) -> (i32, i32, i32) {
    %c0_i32 = arith.constant 0 : i32
    %c0_i32_0 = arith.constant 0 : i32
    %c0_i32_1 = arith.constant 0 : i32
    return %arg0, %c0_i32, %c0_i32_0 : i32, i32, i32
  }
  func.func @transform_8(%arg0: i32) -> (i32, i32) {
    %c0_i32 = arith.constant 0 : i32
    %c0_i32_0 = arith.constant 0 : i32
    return %arg0, %c0_i32 : i32, i32
  }
  func.func @transform_9(%arg0: i32) -> (i32, i32) {
    %c0_i32 = arith.constant 0 : i32
    %c0_i32_0 = arith.constant 0 : i32
    return %arg0, %c0_i32 : i32, i32
  }
}

</mosaic_0001>

<bundles_post_ra>
// kernel: tpu_custom_call.1
= control target key start
LH: loop header
LB: loop body
LE: loop exit
PB: predicated region body
PF: predicated region fallthrough
CT: control target
= control target key end

     0   :  { %15 = vsyncpa [#allocation3], 0  ;;  %s772_s0 = inlined_call_operand.vmem [shape: bf16[2,16,32], index: 0, kind: input, shape index: {}]   ;;  %s773_s1 = inlined_call_operand.vmem [shape: bf16[32,16], index: 1, kind: input, shape index: {}]   ;;  %s774_s2 = inlined_call_operand.vmem [shape: f32[1,16], index: 2, kind: input, shape index: {}]   ;;  %s775_s3 = inlined_call_operand.vmem [shape: bf16[32,32], index: 3, kind: input, shape index: {}]   ;;  %s776_s4 = inlined_call_operand.vmem [shape: f32[1,32], index: 4, kind: input, shape index: {}]   ;;  %s777_s5 = inlined_call_operand.hbm [shape: bf16[32,32], index: 5, kind: input, shape index: {}]   ;;  %s778_s6 = inlined_call_operand.vmem [shape: f32[1,32], index: 6, kind: input, shape index: {}]   ;;  %s779_s7 = inlined_call_operand.hbm [shape: bf16[2,16,16], index: 7, kind: output, shape index: {0}]   ;;  %s780_s8 = inlined_call_operand.hbm [shape: f32[2,32], index: 8, kind: output, shape index: {1}]   ;;  %s781_s9 = inlined_call_operand.hbm [shape: f32[2,32], index: 9, kind: output, shape index: {2}]  }
   0x1   :  { %16 = vsyncpa [#allocation4], 0 }
   0x2   :  { %17 = vsyncpa [#allocation7], 0  ;;  %s621_s30 = smov [#allocation2]   ;;  %s527_s13 = scalar_lea.hbm %s777_s5, 256 }
   0x3   :  { %s33_s10 = sshll.u32 %s621_s30, 4  ;;  %p528_p0 = scmp.ne.s32.totalorder %s777_s5, %s527_s13  ;;  %s34_s10 = int_to_ptr.vmem [resolvable:$true] %s33_s10 }
   0x4   :  { %p531_p1 = scmp.lt.u32.totalorder %s527_s13, %s777_s5 }
   0x6   :  { %p533_p2 = pnand %p531_p1, %p528_p0 }
   0x8   :  { %536 = shalt.err (!%p533_p2)
}
   0x9   :  { %s537_s18 = scalar_lea.vmem %s34_s10, 256  ;;  %p542_p4 = scmp.lt.s32.totalorder %s34_s10, %s34_s10 }
   0xa   :  { %p538_p3 = scmp.ne.s32.totalorder %s34_s10, %s537_s18  ;;  %p543_p5 = scmp.lt.s32.totalorder %s537_s18, %s537_s18 }
   0xc   :  { %p544_p6 = por %p543_p5, %p542_p4 }
   0xe   :  { %p545_p7 = pnand %p544_p6, %p538_p3 }
  0x10   :  { %548 = shalt.err (!%p545_p7)
}
  0x11   :  { %s622_s19 = smov 64   ;;  %s623_s20 = smov 4  }
  0x12   :  { %39 = dma.hbm_to_vmem [thread:$0]  %s777_s5, 256, %s34_s10, [#allocation3], %s622_s19, %s622_s19, %s623_s20  }
  0x13   :  { %615 = dma.done.wait [#allocation3], 256  }
  0x14   :  { %616 = vsyncadd [#allocation3], 4294967040  ;;  %v624_v0 = vmov 0.0   ;;  %vm625_vm0 = vmmov 0   ;;  %v519_v1 = vld [vmem:[%s772_s0] sm:$0xff]   ;;  %v520_v2 = vld [vmem:[%s772_s0 + $0x8] sm:$0xff]  }
  0x15   :  { %474 = vmatprep.subr.bf16.mxu0 %v624_v0  ;;  %480 = vmatprep.subr.bf16.mxu1 %v624_v0  ;;  %vm57_vm1 = vcmask 130048   ;;  %v626_v3 = vmov 1065369472   ;;  %v521_v4 = vld [vmem:[%s775_s3] sm:$0xff]   ;;  %v523_v6 = vld [vmem:[%s775_s3 + $0x8] sm:$0xff]   ;;  %vm167_vm2 = vcmask 1041409  }
  0x16   :  { %476 = vmatprep.mubr.msk.bf16.mxu0 %vm625_vm0, %v624_v0  ;;  %482 = vmatprep.mubr.msk.bf16.mxu1 %vm625_vm0, %v624_v0  ;;  %v522_v5 = vld [vmem:[#allocation2] sm:$0xff]   ;;  %v524_v7 = vld [vmem:[#allocation2 + $0x8] sm:$0xff]   ;;  %vm182_vm3 = vcmask 261120   ;;  %s627_s15 = smov [#allocation6]   ;;  %s628_s17 = smov [#allocation8]   ;;  %vm226_vm4 = vcmask 254976  }
  0x17   :  { %475 = vmatpush3.bf16.msra.mxu0 %v519_v1  ;;  %481 = vmatpush3.bf16.msra.mxu1 %v520_v2  ;;  %v525_v8 = vld [vmem:[%s773_s1] sm:$0xff]   ;;  %v526_v26 = vld [vmem:[%s773_s1 + $0x8] sm:$0xff]   ;;  %s409_s16 = sshll.u32 %s627_s15, 4  ;;  %s419_s18 = sshll.u32 %s628_s17, 4  ;;  %s410_s16 = int_to_ptr.vmem [resolvable:$true] %s409_s16  ;;  %s719_s18 = int_to_ptr.vmem [resolvable:$true] %s419_s18 }
  0x18   :  { %486 = vmatprep.subr.bf16.mxu0 %v624_v0  ;;  %494 = vmatprep.subr.bf16.mxu1 %v624_v0  ;;  %v439_v27 = vld [vmem:[%s776_s4] ss:$0 sm:$0xff]  ;;  %s549_s1 = scalar_lea.vmem %s410_s16, 32  ;;  %p554_p9 = scmp.lt.s32.totalorder %s410_s16, %s410_s16 }
  0x19   :  { %v443_v28 = vld [vmem:[%s778_s6] ss:$0 sm:$0xff]  ;;  %p550_p8 = scmp.ne.s32.totalorder %s410_s16, %s549_s1  ;;  %p555_p10 = scmp.lt.s32.totalorder %s549_s1, %s549_s1 }
  0x1a   :  { %477 = vmatmul.mubr.msk.bf16.vlgmr.msra.gmra.mrb[0].mxu0 %vm57_vm1, %v626_v3  ;;  %483 = vmatmul.mubr.msk.bf16.vlgmr.msra.gmra.mrb[0].mxu1 %vm57_vm1, %v626_v3 }
  0x1b   :  { %490 = vmatprep.mubr.msk.bf16.mxu0 %vm625_vm0, %v624_v0  ;;  %498 = vmatprep.mubr.msk.bf16.mxu1 %vm625_vm0, %v624_v0  ;;  %p556_p11 = por %p555_p10, %p554_p9 }
  0x1c   :  { %487 = vmatpush3.bf16.msra.mxu0 %v521_v4  ;;  %495 = vmatpush3.bf16.msra.mxu1 %v522_v5 }
  0x1d   :  { %488 = vmatprep.subr.bf16.mxu0 %v624_v0  ;;  %496 = vmatprep.subr.bf16.mxu1 %v624_v0  ;;  %p557_p12 = pnand %p556_p11, %p550_p8 }
  0x20   :  { %489 = vmatpush3.bf16.msra.mxu0 %v523_v6  ;;  %497 = vmatpush3.bf16.msra.mxu1 %v524_v7 }
  0x21   :  { %502 = vmatprep.subr.bf16.mxu0 %v525_v8 }
  0xed   :  { %v95_v9 = vpop.f32.mrb[0].mxu0  ;;  %v141_v11 = vpop.f32.mrb[0].mxu1 }
  0xee   :  { %v147_v10 = vmul.f32 0.0625, %v95_v9  ;;  %v478_v12 = vpop.f32.mrb[1].mxu0  ;;  %v148_v13 = vmul.f32 0.0625, %v141_v11  ;;  %v484_v14 = vpop.f32.mrb[1].mxu1 }
  0xef   :  { %v98_v15 = vpop.f32.mrb[2].mxu0  ;;  %v144_v17 = vpop.f32.mrb[2].mxu1 }
  0xf0   :  { %v149_v16 = vpack.c.bf16 %v147_v10, %v147_v10  ;;  %v479_v18 = vpop.f32.mrb[3].mxu0  ;;  %v150_v19 = vpack.c.bf16 %v148_v13, %v148_v13  ;;  %v485_v20 = vpop.f32.mrb[3].mxu1 }
  0xf2   :  { %v164_v21 = vunpack.c.l.b16 %v149_v16  ;;  %v165_v22 = vunpack.c.l.b16 %v150_v19 }
  0xf4   :  { %v166_v23 = vrot.slane %v165_v22, 7 }
  0xf6   :  { %v168_v24 = vsel %vm167_vm2, %v166_v23, %v164_v21 }
  0xf7   :  { %v169_v25 = vpack.c.b16 %v168_v24, %v168_v24 }
  0xf9   :  { %491 = vmatmul.mubr.msk.bf16.vlgmr.msra.gmra.mrb[4].mxu0 %vm182_vm3, %v169_v25  ;;  %499 = vmatmul.mubr.msk.bf16.vlgmr.msra.gmra.mrb[4].mxu1 %vm182_vm3, %v169_v25 }
  0xfa   :  { %503 = vmatpush3.bf16.msra.mxu0 %v525_v8  ;;  %506 = vmatprep.mubr.msk.bf16.mxu0 %vm182_vm3, %v519_v1 }
  0xfb   :  { %504 = vmatprep.subr.bf16.mxu0 %v526_v26 }
  0xfe   :  { %505 = vmatpush3.bf16.msra.mxu0 %v526_v26 }
 0x101   :  { %507 = vmatmul.mubr.msk.bf16.vlgmr.msra.gmra.mrb[8].mxu0 %vm182_vm3, %v520_v2 }
 0x1cc   :  { %v220_v29 = vpop.f32.mrb[4].mxu0  ;;  %v285_v30 = vpop.f32.mrb[4].mxu1 }
 0x1cd   :  { %v221_v31 = vadd.f32 %v439_v27, %v220_v29  ;;  %v286_v32 = vadd.f32 %v443_v28, %v285_v30  ;;  %v492_v33 = vpop.f32.mrb[5].mxu0  ;;  %v500_v34 = vpop.f32.mrb[5].mxu1 }
 0x1ce   :  { %v223_v35 = vpop.f32.mrb[6].mxu0  ;;  %v288_v36 = vpop.f32.mrb[6].mxu1 }
 0x1cf   :  { %v493_v37 = vpop.f32.mrb[7].mxu0  ;;  %v501_v38 = vpop.f32.mrb[7].mxu1  ;;  %227 = vst.msk [vmem:[#allocation6] sm:$0x3] %vm226_vm4, %v221_v31  ;;  %291 = vst.msk [vmem:[#allocation8] sm:$0x3] %vm226_vm4, %v286_v32 }
 0x1d0   :  { %560 = shalt.err (!%p557_p12)
}
 0x1d1   :  { %s561_s21 = scalar_lea.hbm %s780_s8, 32 }
 0x1d2   :  { %p562_p13 = scmp.ne.s32.totalorder %s780_s8, %s561_s21  ;;  %p565_p0 = scmp.lt.u32.totalorder %s561_s21, %s780_s8 }
 0x1d4   :  { %p567_p1 = pnand %p565_p0, %p562_p13 }
 0x1d6   :  { %570 = shalt.err (!%p567_p1)
}
 0x1d7   :  { %412 = dma.vmem_to_hbm [thread:$0]  %s410_s16, 32, %s780_s8, [#allocation7]  }
 0x1d8   :  { %s571_s27 = scalar_lea.vmem %s719_s18, 32  ;;  %p576_p3 = scmp.lt.s32.totalorder %s719_s18, %s719_s18 }
 0x1d9   :  { %p572_p2 = scmp.ne.s32.totalorder %s719_s18, %s571_s27  ;;  %p577_p4 = scmp.lt.s32.totalorder %s571_s27, %s571_s27 }
 0x1db   :  { %p578_p5 = por %p577_p4, %p576_p3 }
 0x1dd   :  { %p579_p6 = pnand %p578_p5, %p572_p2 }
 0x1df   :  { %582 = shalt.err (!%p579_p6)
}
 0x1e0   :  { %s583_s29 = scalar_lea.hbm %s781_s9, 32 }
 0x1e1   :  { %p584_p7 = scmp.ne.s32.totalorder %s781_s9, %s583_s29  ;;  %p587_p8 = scmp.lt.u32.totalorder %s583_s29, %s781_s9 }
 0x1e3   :  { %p589_p9 = pnand %p587_p8, %p584_p7 }
 0x1e5   :  { %592 = shalt.err (!%p589_p9)
}
 0x1e6   :  { %422 = dma.vmem_to_hbm [thread:$0]  %s719_s18, 32, %s781_s9, [#allocation7]   ;;  %v447_v39 = vld [vmem:[%s774_s2] ss:$0 sm:$0xff]  ;;  %v508_v40 = vpop.f32.mrb[8].mxu0  ;;  %vm386_vm5 = vcmask 125952  }
 0x1e7   :  { %v364_v41 = vadd.f32 %v508_v40, %v447_v39  ;;  %v355_v42 = vpop.f32.mrb[9].mxu0  ;;  %s629_s15 = smov [#allocation5]  }
 0x1e8   :  { %v356_v43 = vadd.f32 %v447_v39, %v355_v42  ;;  %v509_v44 = vpop.f32.mrb[10].mxu0  ;;  %s396_s16 = sshll.u32 %s629_s15, 4  ;;  %s397_s16 = int_to_ptr.vmem [resolvable:$true] %s396_s16 }
 0x1e9   :  { %v458_v45 = vpack.c.bf16 %v364_v41, %v364_v41  ;;  %v367_v46 = vadd.f32 %v509_v44, %v447_v39  ;;  %v358_v47 = vpop.f32.mrb[11].mxu0  ;;  %s593_s2 = scalar_lea.vmem %s397_s16, 256  ;;  %p598_p11 = scmp.lt.s32.totalorder %s397_s16, %s397_s16 }
 0x1ea   :  { %v456_v48 = vpack.c.bf16 %v356_v43, %v356_v43  ;;  %v359_v49 = vadd.f32 %v447_v39, %v358_v47  ;;  %p594_p10 = scmp.ne.s32.totalorder %s397_s16, %s593_s2  ;;  %p599_p12 = scmp.lt.s32.totalorder %s593_s2, %s593_s2 }
 0x1eb   :  { %389 = vst.msk [vmem:[#allocation5 + $0x8] sm:$0xf] %vm386_vm5, %v458_v45  ;;  %v459_v50 = vpack.c.bf16 %v367_v46, %v367_v46 }
 0x1ec   :  { %387 = vst.msk [vmem:[#allocation5] sm:$0xf] %vm386_vm5, %v456_v48  ;;  %v457_v51 = vpack.c.bf16 %v359_v49, %v359_v49  ;;  %p600_p13 = por %p599_p12, %p598_p11 }
 0x1ed   :  { %390 = vst.msk [vmem:[#allocation5 + $0xc] sm:$0xf] %vm386_vm5, %v459_v50 }
 0x1ee   :  { %388 = vst.msk [vmem:[#allocation5 + $0x4] sm:$0xf] %vm386_vm5, %v457_v51  ;;  %p601_p0 = pnand %p600_p13, %p594_p10 }
 0x1f0   :  { %604 = shalt.err (!%p601_p0)
}
 0x1f1   :  { %s605_s18 = scalar_lea.hbm %s779_s7, 256 }
 0x1f2   :  { %p606_p1 = scmp.ne.s32.totalorder %s779_s7, %s605_s18  ;;  %p609_p2 = scmp.lt.u32.totalorder %s605_s18, %s779_s7 }
 0x1f4   :  { %p611_p3 = pnand %p609_p2, %p606_p1 }
 0x1f6   :  { %614 = shalt.err (!%p611_p3)
}
 0x1f7   :  { %402 = dma.vmem_to_hbm [thread:$0]  %s397_s16, 256, %s779_s7, [#allocation4], %s622_s19, %s622_s19, %s623_s20  }
 0x1f8   :  { %617 = dma.done.wait [#allocation4], 256  }
 0x1f9   :  { %618 = vsyncadd [#allocation4], 4294967040 }
 0x1fa   :  { %619 = dma.done.wait [#allocation7], 64  }
 0x1fb   :  { %620 = vsyncadd [#allocation7], 4294967232 }
 0x1fc   :  { %432 = vsyncpa [#allocation3], 1 }
 0x1fd   :  { %433 = vsyncpa [#allocation4], 1 }
 0x1fe   :  { %434 = vsyncpa [#allocation7], 1 }

</bundles_post_ra>
